<compile_context>
chip_gen: v7x
topology: tpu7x:2x2x1
jax: 0.10.0
libtpu: 0.0.40
codegen_flags: <defaults>
</compile_context>

<pallas_src>
import math
from functools import partial

import jax
import jax.numpy as jnp
import numpy as np
from jax.experimental import pallas as pl
from jax.experimental.pallas import tpu as pltpu

MAX_LEN = 5000
FREQ_DIM = 786          # frequency_embedding_dim from the module default
LANE = 128
CHUNK_ROWS = 256        # rows per grid step when B is large (multiple of 8)
MAX_INFLIGHT = 16       # bounded window of concurrent row DMAs per grid step


def gen_pos_encoding(max_len: int, dim: int) -> jnp.ndarray:
    """Deterministic sinusoidal positional-encoding table (utils.gen_pos_encoding)."""
    pos = jnp.arange(max_len, dtype=jnp.float32)[:, None]                  # (L, 1)
    div = jnp.exp(
        jnp.arange(0, dim, 2, dtype=jnp.float32) * (-math.log(10000.0) / dim)
    )                                                                      # (D/2,)
    pe = jnp.zeros((max_len, dim), dtype=jnp.float32)
    pe = pe.at[:, 0::2].set(jnp.sin(pos * div))
    pe = pe.at[:, 1::2].set(jnp.cos(pos * div))
    return pe


def build_timestep_embedder_table(max_len: int = MAX_LEN,
                                  freq_dim: int = FREQ_DIM) -> jnp.ndarray:
    """Analogue of the module __init__: precompute the table, lane-padded once."""
    table = gen_pos_encoding(max_len, freq_dim)
    d_pad = pl.cdiv(freq_dim, LANE) * LANE           # 786 -> 896
    if d_pad != freq_dim:
        table = jnp.pad(table, ((0, 0), (0, d_pad - freq_dim)))
    return table                                      # (max_len, d_pad), f32


def _gather_rows_kernel(t_ref, table_hbm, out_ref, sem, *,
                        chunk_rows: int, max_len: int, single_timestep: bool):
    """Fetch `chunk_rows` table rows for this grid step via concurrent DMAs.

    t_ref:     SMEM (B_pad,) int32 indices (scalar prefetch)
    table_hbm: HBM (L, D_pad) table, never staged wholesale in VMEM
    out_ref:   VMEM (chunk_rows, D_pad) resident output block for this step
    sem:       single shared DMA semaphore (all copies are equal-sized rows)
    """
    base = pl.program_id(0) * chunk_rows

    def clamp(idx):
        # In-kernel OOB insurance (PyTorch would raise; we clamp).
        return jnp.minimum(jnp.maximum(idx, 0), max_len - 1)

    if single_timestep:
        # Broadcast fast path: one row fetch + VPU replicate across sublanes.
        idx = clamp(t_ref[0])
        cp = pltpu.make_async_copy(
            table_hbm.at[pl.ds(idx, 1), :],
            out_ref.at[pl.ds(0, 1), :],
            sem,
        )
        cp.start()
        cp.wait()
        out_ref[...] = jnp.broadcast_to(out_ref[pl.ds(0, 1), :], out_ref.shape)
        return

    window = min(MAX_INFLIGHT, chunk_rows)
    copies = []
    for b in range(chunk_rows):                       # static unroll, bounded window
        if b >= window:
            copies[b - window].wait()                 # keep <= `window` rows in flight
        idx = clamp(t_ref[base + b])
        cp = pltpu.make_async_copy(
            table_hbm.at[pl.ds(idx, 1), :],           # one (1, D_pad) row in HBM
            out_ref.at[pl.ds(b, 1), :],               # its slot in the output block
            sem,
        )
        copies.append(cp)
        cp.start()
    for cp in copies[max(0, chunk_rows - window):]:   # drain remaining in-flight copies
        cp.wait()


def timestep_embedder_forward(t: jnp.ndarray,
                              padded_table: jnp.ndarray,
                              freq_dim: int = FREQ_DIM,
                              *,
                              single_timestep: bool = False,
                              return_padded: bool = False) -> jnp.ndarray:
    """out[b, :] = table[t[b], :]  (the TimestepEmbedder forward pass).

    single_timestep=True is a caller-asserted fast path: all entries of `t`
    are identical, so only one row is fetched and broadcast.
    return_padded=True keeps the lane-padded (B, 896) slab (zero columns) for
    a downstream matmul; default slices back to freq_dim for exact semantics.
    """
    squeeze = False
    if t.ndim == 0:                                   # scalar timestep -> (786,)
        t = t[None]
        squeeze = True
        single_timestep = True
    assert t.ndim == 1

    B = t.shape[0]
    L, D_pad = padded_table.shape
    t = t.astype(jnp.int32)

    if B <= CHUNK_ROWS:
        chunk, num_chunks, b_pad = B, 1, B
    else:
        chunk = CHUNK_ROWS
        num_chunks = pl.cdiv(B, chunk)
        b_pad = num_chunks * chunk
        if b_pad != B:
            t = jnp.pad(t, (0, b_pad - B))            # padded rows fetch row t[pad]=0, discarded below

    kernel = partial(_gather_rows_kernel, chunk_rows=chunk, max_len=L,
                     single_timestep=single_timestep)

    grid_spec = pltpu.PrefetchScalarGridSpec(
        num_scalar_prefetch=1,                        # `t` -> SMEM
        grid=(num_chunks,),
        in_specs=[pl.BlockSpec(memory_space=pl.ANY)], # table stays in HBM
        out_specs=pl.BlockSpec((chunk, D_pad), lambda i, t_sm: (i, 0)),
        scratch_shapes=[pltpu.SemaphoreType.DMA],     # one shared DMA semaphore
    )

    out = pl.pallas_call(
        kernel,
        out_shape=jax.ShapeDtypeStruct((b_pad, D_pad), padded_table.dtype),
        grid_spec=grid_spec,
        compiler_params=pltpu.CompilerParams(
            dimension_semantics=("parallel",),        # v7x: split row chunks across TCs
        ),
        cost_estimate=pl.CostEstimate(
            flops=0, transcendentals=0,
            bytes_accessed=2 * int(b_pad) * int(D_pad) * 4,
        ),
    )(t, padded_table)

    if not return_padded:
        out = out[:B, :freq_dim]                      # drop batch + lane padding
    elif b_pad != B:
        out = out[:B, :]
    if squeeze:
        out = out[0]
    return out


if __name__ == "__main__":
    key = jax.random.PRNGKey(0)

    # Precomputed buffer (as in the module's __init__), lane-padded once.
    padded_table = build_timestep_embedder_table(MAX_LEN, FREQ_DIM)
    ref_table = gen_pos_encoding(MAX_LEN, FREQ_DIM)

    # Small batch of integer timesteps in [0, MAX_LEN).
    B = 8
    t = jax.random.randint(key, (B,), minval=0, maxval=MAX_LEN, dtype=jnp.int32)

    out = timestep_embedder_forward(t, padded_table, FREQ_DIM)
    out = jax.block_until_ready(out)
    ref = ref_table[t, :]
    np.testing.assert_allclose(np.asarray(out), np.asarray(ref), rtol=0, atol=0)

    # Broadcast fast path: whole batch shares one timestep (sampling loops).
    t_same = jnp.full((B,), 1234, dtype=jnp.int32)
    out_same = timestep_embedder_forward(t_same, padded_table, FREQ_DIM,
                                         single_timestep=True)
    out_same = jax.block_until_ready(out_same)
    np.testing.assert_allclose(np.asarray(out_same),
                               np.asarray(ref_table[t_same, :]), rtol=0, atol=0)

    print("KERNEL_OK")
</pallas_src>

<mosaic_0001>
module attributes {stable_mosaic.version = 11 : i64} {
  func.func @_gather_rows_kernel(%arg0: i32, %arg1: memref<8xi32, #tpu.memory_space<smem>>, %arg2: memref<5000x896xf32, #tpu.memory_space<any>>, %arg3: memref<8x896xf32, #tpu.memory_space<vmem>>, %arg4: memref<!tpu.dma_semaphore, #tpu.memory_space<semaphore_mem>>) attributes {dimension_semantics = [#tpu.dimension_semantics<parallel>], iteration_bounds = array<i64: 1>, scalar_prefetch = 1 : i64, scratch_operands = 1 : i64, tpu.core_type = #tpu.core_type<tc>, window_params = [{}, {transform_indices = @transform_1, window_bounds = array<i64: 8, 896>}]} {
    %c8_i32 = arith.constant 8 : i32
    %0 = arith.muli %arg0, %c8_i32 : i32
    %c0_i32 = arith.constant 0 : i32
    %1 = arith.addi %0, %c0_i32 : i32
    %2 = arith.index_cast %1 : i32 to index
    %3 = memref.load %arg1[%2] : memref<8xi32, #tpu.memory_space<smem>>
    %c0_i32_0 = arith.constant 0 : i32
    %4 = arith.maxsi %3, %c0_i32_0 : i32
    %c4999_i32 = arith.constant 4999 : i32
    %5 = arith.minsi %4, %c4999_i32 : i32
    %c0_i32_1 = arith.constant 0 : i32
    %6 = tpu.memref_slice %arg2[%5, %c0_i32_1] : memref<5000x896xf32, #tpu.memory_space<any>> -> memref<1x896xf32, #tpu.memory_space<any>>
    %c0_i32_2 = arith.constant 0 : i32
    %c0_i32_3 = arith.constant 0 : i32
    %7 = tpu.memref_slice %arg3[%c0_i32_2, %c0_i32_3] : memref<8x896xf32, #tpu.memory_space<vmem>> -> memref<1x896xf32, #tpu.memory_space<vmem>>
    tpu.enqueue_dma source(%6 : memref<1x896xf32, #tpu.memory_space<any>>) target(%7 : memref<1x896xf32, #tpu.memory_space<vmem>>) target_semaphore(%arg4 : memref<!tpu.dma_semaphore, #tpu.memory_space<semaphore_mem>>)
    %c1_i32 = arith.constant 1 : i32
    %8 = arith.addi %0, %c1_i32 : i32
    %9 = arith.index_cast %8 : i32 to index
    %10 = memref.load %arg1[%9] : memref<8xi32, #tpu.memory_space<smem>>
    %c0_i32_4 = arith.constant 0 : i32
    %11 = arith.maxsi %10, %c0_i32_4 : i32
    %c4999_i32_5 = arith.constant 4999 : i32
    %12 = arith.minsi %11, %c4999_i32_5 : i32
    %c0_i32_6 = arith.constant 0 : i32
    %13 = tpu.memref_slice %arg2[%12, %c0_i32_6] : memref<5000x896xf32, #tpu.memory_space<any>> -> memref<1x896xf32, #tpu.memory_space<any>>
    %c1_i32_7 = arith.constant 1 : i32
    %c0_i32_8 = arith.constant 0 : i32
    %14 = tpu.memref_slice %arg3[%c1_i32_7, %c0_i32_8] : memref<8x896xf32, #tpu.memory_space<vmem>> -> memref<1x896xf32, #tpu.memory_space<vmem>>
    tpu.enqueue_dma source(%13 : memref<1x896xf32, #tpu.memory_space<any>>) target(%14 : memref<1x896xf32, #tpu.memory_space<vmem>>) target_semaphore(%arg4 : memref<!tpu.dma_semaphore, #tpu.memory_space<semaphore_mem>>)
    %c2_i32 = arith.constant 2 : i32
    %15 = arith.addi %0, %c2_i32 : i32
    %16 = arith.index_cast %15 : i32 to index
    %17 = memref.load %arg1[%16] : memref<8xi32, #tpu.memory_space<smem>>
    %c0_i32_9 = arith.constant 0 : i32
    %18 = arith.maxsi %17, %c0_i32_9 : i32
    %c4999_i32_10 = arith.constant 4999 : i32
    %19 = arith.minsi %18, %c4999_i32_10 : i32
    %c0_i32_11 = arith.constant 0 : i32
    %20 = tpu.memref_slice %arg2[%19, %c0_i32_11] : memref<5000x896xf32, #tpu.memory_space<any>> -> memref<1x896xf32, #tpu.memory_space<any>>
    %c2_i32_12 = arith.constant 2 : i32
    %c0_i32_13 = arith.constant 0 : i32
    %21 = tpu.memref_slice %arg3[%c2_i32_12, %c0_i32_13] : memref<8x896xf32, #tpu.memory_space<vmem>> -> memref<1x896xf32, #tpu.memory_space<vmem>>
    tpu.enqueue_dma source(%20 : memref<1x896xf32, #tpu.memory_space<any>>) target(%21 : memref<1x896xf32, #tpu.memory_space<vmem>>) target_semaphore(%arg4 : memref<!tpu.dma_semaphore, #tpu.memory_space<semaphore_mem>>)
    %c3_i32 = arith.constant 3 : i32
    %22 = arith.addi %0, %c3_i32 : i32
    %23 = arith.index_cast %22 : i32 to index
    %24 = memref.load %arg1[%23] : memref<8xi32, #tpu.memory_space<smem>>
    %c0_i32_14 = arith.constant 0 : i32
    %25 = arith.maxsi %24, %c0_i32_14 : i32
    %c4999_i32_15 = arith.constant 4999 : i32
    %26 = arith.minsi %25, %c4999_i32_15 : i32
    %c0_i32_16 = arith.constant 0 : i32
    %27 = tpu.memref_slice %arg2[%26, %c0_i32_16] : memref<5000x896xf32, #tpu.memory_space<any>> -> memref<1x896xf32, #tpu.memory_space<any>>
    %c3_i32_17 = arith.constant 3 : i32
    %c0_i32_18 = arith.constant 0 : i32
    %28 = tpu.memref_slice %arg3[%c3_i32_17, %c0_i32_18] : memref<8x896xf32, #tpu.memory_space<vmem>> -> memref<1x896xf32, #tpu.memory_space<vmem>>
    tpu.enqueue_dma source(%27 : memref<1x896xf32, #tpu.memory_space<any>>) target(%28 : memref<1x896xf32, #tpu.memory_space<vmem>>) target_semaphore(%arg4 : memref<!tpu.dma_semaphore, #tpu.memory_space<semaphore_mem>>)
    %c4_i32 = arith.constant 4 : i32
    %29 = arith.addi %0, %c4_i32 : i32
    %30 = arith.index_cast %29 : i32 to index
    %31 = memref.load %arg1[%30] : memref<8xi32, #tpu.memory_space<smem>>
    %c0_i32_19 = arith.constant 0 : i32
    %32 = arith.maxsi %31, %c0_i32_19 : i32
    %c4999_i32_20 = arith.constant 4999 : i32
    %33 = arith.minsi %32, %c4999_i32_20 : i32
    %c0_i32_21 = arith.constant 0 : i32
    %34 = tpu.memref_slice %arg2[%33, %c0_i32_21] : memref<5000x896xf32, #tpu.memory_space<any>> -> memref<1x896xf32, #tpu.memory_space<any>>
    %c4_i32_22 = arith.constant 4 : i32
    %c0_i32_23 = arith.constant 0 : i32
    %35 = tpu.memref_slice %arg3[%c4_i32_22, %c0_i32_23] : memref<8x896xf32, #tpu.memory_space<vmem>> -> memref<1x896xf32, #tpu.memory_space<vmem>>
    tpu.enqueue_dma source(%34 : memref<1x896xf32, #tpu.memory_space<any>>) target(%35 : memref<1x896xf32, #tpu.memory_space<vmem>>) target_semaphore(%arg4 : memref<!tpu.dma_semaphore, #tpu.memory_space<semaphore_mem>>)
    %c5_i32 = arith.constant 5 : i32
    %36 = arith.addi %0, %c5_i32 : i32
    %37 = arith.index_cast %36 : i32 to index
    %38 = memref.load %arg1[%37] : memref<8xi32, #tpu.memory_space<smem>>
    %c0_i32_24 = arith.constant 0 : i32
    %39 = arith.maxsi %38, %c0_i32_24 : i32
    %c4999_i32_25 = arith.constant 4999 : i32
    %40 = arith.minsi %39, %c4999_i32_25 : i32
    %c0_i32_26 = arith.constant 0 : i32
    %41 = tpu.memref_slice %arg2[%40, %c0_i32_26] : memref<5000x896xf32, #tpu.memory_space<any>> -> memref<1x896xf32, #tpu.memory_space<any>>
    %c5_i32_27 = arith.constant 5 : i32
    %c0_i32_28 = arith.constant 0 : i32
    %42 = tpu.memref_slice %arg3[%c5_i32_27, %c0_i32_28] : memref<8x896xf32, #tpu.memory_space<vmem>> -> memref<1x896xf32, #tpu.memory_space<vmem>>
    tpu.enqueue_dma source(%41 : memref<1x896xf32, #tpu.memory_space<any>>) target(%42 : memref<1x896xf32, #tpu.memory_space<vmem>>) target_semaphore(%arg4 : memref<!tpu.dma_semaphore, #tpu.memory_space<semaphore_mem>>)
    %c6_i32 = arith.constant 6 : i32
    %43 = arith.addi %0, %c6_i32 : i32
    %44 = arith.index_cast %43 : i32 to index
    %45 = memref.load %arg1[%44] : memref<8xi32, #tpu.memory_space<smem>>
    %c0_i32_29 = arith.constant 0 : i32
    %46 = arith.maxsi %45, %c0_i32_29 : i32
    %c4999_i32_30 = arith.constant 4999 : i32
    %47 = arith.minsi %46, %c4999_i32_30 : i32
    %c0_i32_31 = arith.constant 0 : i32
    %48 = tpu.memref_slice %arg2[%47, %c0_i32_31] : memref<5000x896xf32, #tpu.memory_space<any>> -> memref<1x896xf32, #tpu.memory_space<any>>
    %c6_i32_32 = arith.constant 6 : i32
    %c0_i32_33 = arith.constant 0 : i32
    %49 = tpu.memref_slice %arg3[%c6_i32_32, %c0_i32_33] : memref<8x896xf32, #tpu.memory_space<vmem>> -> memref<1x896xf32, #tpu.memory_space<vmem>>
    tpu.enqueue_dma source(%48 : memref<1x896xf32, #tpu.memory_space<any>>) target(%49 : memref<1x896xf32, #tpu.memory_space<vmem>>) target_semaphore(%arg4 : memref<!tpu.dma_semaphore, #tpu.memory_space<semaphore_mem>>)
    %c7_i32 = arith.constant 7 : i32
    %50 = arith.addi %0, %c7_i32 : i32
    %51 = arith.index_cast %50 : i32 to index
    %52 = memref.load %arg1[%51] : memref<8xi32, #tpu.memory_space<smem>>
    %c0_i32_34 = arith.constant 0 : i32
    %53 = arith.maxsi %52, %c0_i32_34 : i32
    %c4999_i32_35 = arith.constant 4999 : i32
    %54 = arith.minsi %53, %c4999_i32_35 : i32
    %c0_i32_36 = arith.constant 0 : i32
    %55 = tpu.memref_slice %arg2[%54, %c0_i32_36] : memref<5000x896xf32, #tpu.memory_space<any>> -> memref<1x896xf32, #tpu.memory_space<any>>
    %c7_i32_37 = arith.constant 7 : i32
    %c0_i32_38 = arith.constant 0 : i32
    %56 = tpu.memref_slice %arg3[%c7_i32_37, %c0_i32_38] : memref<8x896xf32, #tpu.memory_space<vmem>> -> memref<1x896xf32, #tpu.memory_space<vmem>>
    tpu.enqueue_dma source(%55 : memref<1x896xf32, #tpu.memory_space<any>>) target(%56 : memref<1x896xf32, #tpu.memory_space<vmem>>) target_semaphore(%arg4 : memref<!tpu.dma_semaphore, #tpu.memory_space<semaphore_mem>>)
    %c0_i32_39 = arith.constant 0 : i32
    %57 = tpu.memref_slice %arg2[%5, %c0_i32_39] : memref<5000x896xf32, #tpu.memory_space<any>> -> memref<1x896xf32, #tpu.memory_space<any>>
    %c0_i32_40 = arith.constant 0 : i32
    %c0_i32_41 = arith.constant 0 : i32
    %58 = tpu.memref_slice %arg3[%c0_i32_40, %c0_i32_41] : memref<8x896xf32, #tpu.memory_space<vmem>> -> memref<1x896xf32, #tpu.memory_space<vmem>>
    tpu.wait_dma2 semaphore(%arg4 : memref<!tpu.dma_semaphore, #tpu.memory_space<semaphore_mem>>) src(%57 : memref<1x896xf32, #tpu.memory_space<any>>) dst(%58 : memref<1x896xf32, #tpu.memory_space<vmem>>)
    %c0_i32_42 = arith.constant 0 : i32
    %59 = tpu.memref_slice %arg2[%12, %c0_i32_42] : memref<5000x896xf32, #tpu.memory_space<any>> -> memref<1x896xf32, #tpu.memory_space<any>>
    %c1_i32_43 = arith.constant 1 : i32
    %c0_i32_44 = arith.constant 0 : i32
    %60 = tpu.memref_slice %arg3[%c1_i32_43, %c0_i32_44] : memref<8x896xf32, #tpu.memory_space<vmem>> -> memref<1x896xf32, #tpu.memory_space<vmem>>
    tpu.wait_dma2 semaphore(%arg4 : memref<!tpu.dma_semaphore, #tpu.memory_space<semaphore_mem>>) src(%59 : memref<1x896xf32, #tpu.memory_space<any>>) dst(%60 : memref<1x896xf32, #tpu.memory_space<vmem>>)
    %c0_i32_45 = arith.constant 0 : i32
    %61 = tpu.memref_slice %arg2[%19, %c0_i32_45] : memref<5000x896xf32, #tpu.memory_space<any>> -> memref<1x896xf32, #tpu.memory_space<any>>
    %c2_i32_46 = arith.constant 2 : i32
    %c0_i32_47 = arith.constant 0 : i32
    %62 = tpu.memref_slice %arg3[%c2_i32_46, %c0_i32_47] : memref<8x896xf32, #tpu.memory_space<vmem>> -> memref<1x896xf32, #tpu.memory_space<vmem>>
    tpu.wait_dma2 semaphore(%arg4 : memref<!tpu.dma_semaphore, #tpu.memory_space<semaphore_mem>>) src(%61 : memref<1x896xf32, #tpu.memory_space<any>>) dst(%62 : memref<1x896xf32, #tpu.memory_space<vmem>>)
    %c0_i32_48 = arith.constant 0 : i32
    %63 = tpu.memref_slice %arg2[%26, %c0_i32_48] : memref<5000x896xf32, #tpu.memory_space<any>> -> memref<1x896xf32, #tpu.memory_space<any>>
    %c3_i32_49 = arith.constant 3 : i32
    %c0_i32_50 = arith.constant 0 : i32
    %64 = tpu.memref_slice %arg3[%c3_i32_49, %c0_i32_50] : memref<8x896xf32, #tpu.memory_space<vmem>> -> memref<1x896xf32, #tpu.memory_space<vmem>>
    tpu.wait_dma2 semaphore(%arg4 : memref<!tpu.dma_semaphore, #tpu.memory_space<semaphore_mem>>) src(%63 : memref<1x896xf32, #tpu.memory_space<any>>) dst(%64 : memref<1x896xf32, #tpu.memory_space<vmem>>)
    %c0_i32_51 = arith.constant 0 : i32
    %65 = tpu.memref_slice %arg2[%33, %c0_i32_51] : memref<5000x896xf32, #tpu.memory_space<any>> -> memref<1x896xf32, #tpu.memory_space<any>>
    %c4_i32_52 = arith.constant 4 : i32
    %c0_i32_53 = arith.constant 0 : i32
    %66 = tpu.memref_slice %arg3[%c4_i32_52, %c0_i32_53] : memref<8x896xf32, #tpu.memory_space<vmem>> -> memref<1x896xf32, #tpu.memory_space<vmem>>
    tpu.wait_dma2 semaphore(%arg4 : memref<!tpu.dma_semaphore, #tpu.memory_space<semaphore_mem>>) src(%65 : memref<1x896xf32, #tpu.memory_space<any>>) dst(%66 : memref<1x896xf32, #tpu.memory_space<vmem>>)
    %c0_i32_54 = arith.constant 0 : i32
    %67 = tpu.memref_slice %arg2[%40, %c0_i32_54] : memref<5000x896xf32, #tpu.memory_space<any>> -> memref<1x896xf32, #tpu.memory_space<any>>
    %c5_i32_55 = arith.constant 5 : i32
    %c0_i32_56 = arith.constant 0 : i32
    %68 = tpu.memref_slice %arg3[%c5_i32_55, %c0_i32_56] : memref<8x896xf32, #tpu.memory_space<vmem>> -> memref<1x896xf32, #tpu.memory_space<vmem>>
    tpu.wait_dma2 semaphore(%arg4 : memref<!tpu.dma_semaphore, #tpu.memory_space<semaphore_mem>>) src(%67 : memref<1x896xf32, #tpu.memory_space<any>>) dst(%68 : memref<1x896xf32, #tpu.memory_space<vmem>>)
    %c0_i32_57 = arith.constant 0 : i32
    %69 = tpu.memref_slice %arg2[%47, %c0_i32_57] : memref<5000x896xf32, #tpu.memory_space<any>> -> memref<1x896xf32, #tpu.memory_space<any>>
    %c6_i32_58 = arith.constant 6 : i32
    %c0_i32_59 = arith.constant 0 : i32
    %70 = tpu.memref_slice %arg3[%c6_i32_58, %c0_i32_59] : memref<8x896xf32, #tpu.memory_space<vmem>> -> memref<1x896xf32, #tpu.memory_space<vmem>>
    tpu.wait_dma2 semaphore(%arg4 : memref<!tpu.dma_semaphore, #tpu.memory_space<semaphore_mem>>) src(%69 : memref<1x896xf32, #tpu.memory_space<any>>) dst(%70 : memref<1x896xf32, #tpu.memory_space<vmem>>)
    %c0_i32_60 = arith.constant 0 : i32
    %71 = tpu.memref_slice %arg2[%54, %c0_i32_60] : memref<5000x896xf32, #tpu.memory_space<any>> -> memref<1x896xf32, #tpu.memory_space<any>>
    %c7_i32_61 = arith.constant 7 : i32
    %c0_i32_62 = arith.constant 0 : i32
    %72 = tpu.memref_slice %arg3[%c7_i32_61, %c0_i32_62] : memref<8x896xf32, #tpu.memory_space<vmem>> -> memref<1x896xf32, #tpu.memory_space<vmem>>
    tpu.wait_dma2 semaphore(%arg4 : memref<!tpu.dma_semaphore, #tpu.memory_space<semaphore_mem>>) src(%71 : memref<1x896xf32, #tpu.memory_space<any>>) dst(%72 : memref<1x896xf32, #tpu.memory_space<vmem>>)
    return
  }
  func.func @transform_1(%arg0: i32, %arg1: memref<8xi32, #tpu.memory_space<smem>>) -> (i32, i32) {
    %c0_i32 = arith.constant 0 : i32
    %c0_i32_0 = arith.constant 0 : i32
    return %arg0, %c0_i32 : i32, i32
  }
}

</mosaic_0001>

<bundles_post_ra>
// kernel: tpu_custom_call.1
= control target key start
LH: loop header
LB: loop body
LE: loop exit
PB: predicated region body
PF: predicated region fallthrough
CT: control target
= control target key end

     0   :  { %s779_s0 = inlined_call_operand.hbm [shape: s32[8], index: 0, kind: input, shape index: {}]   ;;  %s780_s1 = inlined_call_operand.hbm [shape: f32[5000,896], index: 1, kind: input, shape index: {}]   ;;  %s781_s2 = inlined_call_operand.hbm [shape: f32[8,896], index: 2, kind: output, shape index: {}]  }
   0x1   :  { %s307_s11 = scalar_lea.hbm %s779_s0, 16 }
   0x2   :  { %p308_p0 = scmp.ne.s32.totalorder %s779_s0, %s307_s11  ;;  %p311_p1 = scmp.lt.u32.totalorder %s307_s11, %s779_s0 }
   0x4   :  { %p313_p2 = pnand %p311_p1, %p308_p0 }
   0x6   :  { %316 = shalt.err (!%p313_p2)  }
   0x7   :  { %s537_s16 = smov [#allocation4]  }
   0x8   :  { %8 = dma.hbm_to_smem %s779_s0, 16, %s537_s16, [#allocation3] }
   0x9   :  { %531 = dma.done.wait [#allocation3], 16 }
   0xa   :  { %532 = vsyncadd [#allocation3], 4294967280 }
   0xb   :  { %10 = sfence }
   0xc   :  { %11 = vsyncpa [#allocation6], 0  ;;  %s13_s19 = sld [smem:[#allocation4]]  ;;  %s538_s20 = smov [#allocation5]  }
   0xd   :  { %s25_s21 = sshll.u32 %s538_s20, 4  ;;  %s230_s22 = sld [smem:[#allocation4 + $0x1]]  ;;  %s575_s21 = int_to_ptr.vmem [resolvable:$true] %s25_s21 }
   0xe   :  { %s539_s23 = smov [#allocation5 + $0x1]   ;;  %s577_s25 = sld [smem:[#allocation4 + $0x2]] }
   0xf   :  { %s43_s24 = sshll.u32 %s539_s23, 4  ;;  %s540_s0 = smov [#allocation5 + $0x2]   ;;  %s579_s24 = int_to_ptr.vmem [resolvable:$true] %s43_s24 }
  0x10   :  { %s581_s26 = sshll.u32 %s540_s0, 4  ;;  %s583_s27 = sld [smem:[#allocation4 + $0x3]]  ;;  %s619_s26 = int_to_ptr.vmem [resolvable:$true] %s581_s26 }
  0x11   :  { %s597_s13 = scalar_lea.hbm %s780_s1, 560000 }
  0x12   :  { %p14_p3 = scmp.gt.s32.totalorder %s13_s19, 0  ;;  %p224_p4 = scmp.lt.s32.totalorder %s13_s19, 4999 }
  0x13   :  { %p31_p5 = scmp.gt.s32.totalorder %s230_s22, 0  ;;  %p231_p6 = scmp.lt.s32.totalorder %s230_s22, 4999 }
  0x14   :  { %s786_s19 = smov (!%p14_p3, %s13_s19), 0  ;;  %p49_p7 = scmp.gt.s32.totalorder %s577_s25, 0 }
  0x15   :  { %s788_s19 = smov (!%p224_p4, %s786_s19), 4999  ;;  %s790_s22 = smov (!%p31_p5, %s230_s22), 0 }
  0x16   :  { %s18_s28 = sshrl.u32 %s788_s19, 3  ;;  %s19_s29 = sand.u32 7, %s788_s19  }
  0x17   :  { %s20_s30 = smul.u32 56, %s18_s28  ;;  %s792_s22 = smov (!%p231_p6, %s790_s22), 4999 }
  0x18   :  { %p238_p8 = scmp.lt.s32.totalorder %s577_s25, 4999  ;;  %s35_s5 = sshrl.u32 %s792_s22, 3 }
  0x19   :  { %s21_s3 = sadd.s32 %s20_s30, %s19_s29  ;;  %s36_s9 = sand.u32 7, %s792_s22  }
  0x1a   :  { %s229_s4 = sshll.u32 %s21_s3, 4 }
  0x1b   :  { %s23_s8 = scalar_lea.hbm %s780_s1, %s229_s4 }
  0x1c   :  { %s317_s10 = scalar_lea.hbm %s23_s8, 112  ;;  %p320_p10 = scmp.lt.u32.totalorder %s23_s8, %s780_s1 }
  0x1d   :  { %p318_p9 = scmp.ne.s32.totalorder %s23_s8, %s317_s10  ;;  %p321_p11 = scmp.lt.u32.totalorder %s597_s13, %s317_s10 }
  0x1e   :  { %p323_p13 = scmp.lt.u32.totalorder %s317_s10, %s23_s8 }
  0x1f   :  { %p322_p12 = por %p321_p11, %p320_p10 }
  0x21   :  { %p324_p0 = por %p323_p13, %p322_p12 }
  0x23   :  { %p325_p1 = pnand %p324_p0, %p318_p9 }
  0x25   :  { %328 = shalt.err (!%p325_p1)  }
  0x26   :  { %s329_s16 = scalar_lea.vmem %s575_s21, 112  ;;  %s606_s17 = scalar_lea.vmem %s575_s21, 896 }
  0x27   :  { %p330_p2 = scmp.ne.s32.totalorder %s575_s21, %s329_s16  ;;  %p782_p3 = scmp.lt.s32.totalorder %s575_s21, %s575_s21 }
  0x28   :  { %p335_p4 = scmp.lt.s32.totalorder %s606_s17, %s329_s16 }
  0x2a   :  { %p336_p5 = por %p335_p4, %p782_p3 }
  0x2c   :  { %p337_p6 = pnand %p336_p5, %p330_p2 }
  0x2e   :  { %340 = shalt.err (!%p337_p6)  }
  0x2f   :  { %s541_s18 = smov 128   ;;  %s542_s19 = smov 1  }
  0x30   :  { %28 = dma.hbm_to_vmem [thread:$0]  %s23_s8, 112, %s575_s21, [#allocation2], %s541_s18, %s541_s18, %s542_s19 }
  0x31   :  { %s37_s20 = smul.u32 56, %s35_s5  ;;  %p67_p9 = scmp.gt.s32.totalorder %s583_s27, 0 }
  0x32   :  { %s50_s22 = scalar_select %p49_p7, %s577_s25, 0 }
  0x33   :  { %s38_s23 = sadd.s32 %s37_s20, %s36_s9 }
  0x34   :  { %s236_s0 = sshll.u32 %s38_s23, 4 }
  0x35   :  { %s40_s30 = scalar_lea.hbm %s780_s1, %s236_s0 }
  0x36   :  { %s341_s3 = scalar_lea.hbm %s40_s30, 112  ;;  %p344_p12 = scmp.lt.u32.totalorder %s40_s30, %s780_s1 }
  0x37   :  { %p342_p11 = scmp.ne.s32.totalorder %s40_s30, %s341_s3  ;;  %p345_p13 = scmp.lt.u32.totalorder %s597_s13, %s341_s3 }
  0x38   :  { %p347_p1 = scmp.lt.u32.totalorder %s341_s3, %s40_s30 }
  0x39   :  { %p346_p0 = por %p345_p13, %p344_p12 }
  0x3b   :  { %p348_p2 = por %p347_p1, %p346_p0 }
  0x3d   :  { %p349_p4 = pnand %p348_p2, %p342_p11 }
  0x3f   :  { %352 = shalt.err (!%p349_p4)  }
  0x40   :  { %s353_s5 = scalar_lea.vmem %s579_s24, 112  ;;  %p358_p5 = scmp.lt.s32.totalorder %s579_s24, %s575_s21 }
  0x41   :  { %p354_p7 = scmp.ne.s32.totalorder %s579_s24, %s353_s5  ;;  %p359_p6 = scmp.lt.s32.totalorder %s606_s17, %s353_s5 }
  0x43   :  { %p360_p3 = por %p359_p6, %p358_p5 }
  0x45   :  { %p361_p10 = pnand %p360_p3, %p354_p7 }
  0x47   :  { %364 = shalt.err (!%p361_p10)  }
  0x48   :  { %46 = dma.hbm_to_vmem [thread:$0]  %s40_s30, 112, %s579_s24, [#allocation2], %s541_s18, %s541_s18, %s542_s19 }
  0x49   :  { %s794_s22 = smov (!%p238_p8, %s50_s22), 4999  ;;  %s543_s11 = smov [#allocation5 + $0x3]  }
  0x4a   :  { %s68_s7 = scalar_select %p67_p9, %s583_s27, 0 }
  0x4b   :  { %s53_s8 = sshrl.u32 %s794_s22, 3  ;;  %s54_s9 = sand.u32 7, %s794_s22  }
  0x4c   :  { %s55_s10 = smul.u32 56, %s53_s8  ;;  %s79_s12 = sshll.u32 %s543_s11, 4  ;;  %s649_s12 = int_to_ptr.vmem [resolvable:$true] %s79_s12 }
  0x4d   :  { %p783_p3 = scmp.lt.s32.totalorder %s583_s27, 4999 }
  0x4e   :  { %s56_s14 = sadd.s32 %s55_s10, %s54_s9 }
  0x4f   :  { %s796_s7 = smov (!%p783_p3, %s68_s7), 4999  ;;  %s243_s15 = sshll.u32 %s56_s14, 4 }
  0x50   :  { %s71_s16 = sshrl.u32 %s796_s7, 3  ;;  %s58_s24 = scalar_lea.hbm %s780_s1, %s243_s15 }
  0x51   :  { %s72_s25 = sand.u32 7, %s796_s7   ;;  %s365_s0 = scalar_lea.hbm %s58_s24, 112 }
  0x52   :  { %p366_p8 = scmp.ne.s32.totalorder %s58_s24, %s365_s0  ;;  %p368_p9 = scmp.lt.u32.totalorder %s58_s24, %s780_s1 }
  0x53   :  { %p369_p10 = scmp.lt.u32.totalorder %s597_s13, %s365_s0  ;;  %p371_p12 = scmp.lt.u32.totalorder %s365_s0, %s58_s24 }
  0x55   :  { %p370_p11 = por %p369_p10, %p368_p9 }
  0x57   :  { %p372_p13 = por %p371_p12, %p370_p11 }
  0x59   :  { %p373_p0 = pnand %p372_p13, %p366_p8 }
  0x5b   :  { %376 = shalt.err (!%p373_p0)  }
  0x5c   :  { %s377_s27 = scalar_lea.vmem %s619_s26, 112  ;;  %p382_p2 = scmp.lt.s32.totalorder %s619_s26, %s575_s21 }
  0x5d   :  { %p378_p1 = scmp.ne.s32.totalorder %s619_s26, %s377_s27  ;;  %p383_p4 = scmp.lt.s32.totalorder %s606_s17, %s377_s27 }
  0x5f   :  { %p384_p7 = por %p383_p4, %p382_p2 }
  0x61   :  { %p385_p5 = pnand %p384_p7, %p378_p1 }
  0x63   :  { %388 = shalt.err (!%p385_p5)  }
  0x64   :  { %64 = dma.hbm_to_vmem [thread:$0]  %s58_s24, 112, %s619_s26, [#allocation2], %s541_s18, %s541_s18, %s542_s19 }
  0x65   :  { %s73_s22 = smul.u32 56, %s71_s16  ;;  %s667_s30 = sld [smem:[#allocation4 + $0x4]] }
  0x66   :  { %s669_s3 = sld [smem:[#allocation4 + $0x5]]  ;;  %s544_s6 = smov [#allocation5 + $0x4]  }
  0x67   :  { %s74_s4 = sadd.s32 %s73_s22, %s72_s25  ;;  %s97_s5 = sshll.u32 %s544_s6, 4  ;;  %s671_s5 = int_to_ptr.vmem [resolvable:$true] %s97_s5 }
  0x68   :  { %s250_s7 = sshll.u32 %s74_s4, 4 }
  0x69   :  { %s76_s10 = scalar_lea.hbm %s780_s1, %s250_s7 }
  0x6a   :  { %s389_s11 = scalar_lea.hbm %s76_s10, 112  ;;  %p392_p3 = scmp.lt.u32.totalorder %s76_s10, %s780_s1 }
  0x6b   :  { %p390_p6 = scmp.ne.s32.totalorder %s76_s10, %s389_s11  ;;  %p393_p8 = scmp.lt.u32.totalorder %s597_s13, %s389_s11 }
  0x6c   :  { %p395_p10 = scmp.lt.u32.totalorder %s389_s11, %s76_s10 }
  0x6d   :  { %p394_p9 = por %p393_p8, %p392_p3 }
  0x6f   :  { %p396_p11 = por %p395_p10, %p394_p9 }
  0x71   :  { %p397_p12 = pnand %p396_p11, %p390_p6 }
  0x73   :  { %400 = shalt.err (!%p397_p12)  }
  0x74   :  { %s401_s26 = scalar_lea.vmem %s649_s12, 112  ;;  %p406_p0 = scmp.lt.s32.totalorder %s649_s12, %s575_s21 }
  0x75   :  { %p402_p13 = scmp.ne.s32.totalorder %s649_s12, %s401_s26  ;;  %p407_p1 = scmp.lt.s32.totalorder %s606_s17, %s401_s26 }
  0x77   :  { %p408_p2 = por %p407_p1, %p406_p0 }
  0x79   :  { %p409_p4 = pnand %p408_p2, %p402_p13 }
  0x7b   :  { %412 = shalt.err (!%p409_p4)  }
  0x7c   :  { %82 = dma.hbm_to_vmem [thread:$0]  %s76_s10, 112, %s649_s12, [#allocation2], %s541_s18, %s541_s18, %s542_s19 }
  0x7d   :  { %p85_p7 = scmp.gt.s32.totalorder %s667_s30, 0  ;;  %p252_p5 = scmp.lt.s32.totalorder %s667_s30, 4999 }
  0x7e   :  { %p103_p6 = scmp.gt.s32.totalorder %s669_s3, 0  ;;  %p259_p3 = scmp.lt.s32.totalorder %s669_s3, 4999 }
  0x7f   :  { %s798_s30 = smov (!%p85_p7, %s667_s30), 0  ;;  %s545_s29 = smov [#allocation5 + $0x5]  }
  0x80   :  { %s800_s3 = smov (!%p103_p6, %s669_s3), 0  ;;  %s802_s30 = smov (!%p252_p5, %s798_s30), 4999 }
  0x81   :  { %s804_s3 = smov (!%p259_p3, %s800_s3), 4999  ;;  %s89_s16 = sshrl.u32 %s802_s30, 3 }
  0x82   :  { %s90_s20 = sand.u32 7, %s802_s30   ;;  %s91_s23 = smul.u32 56, %s89_s16 }
  0x83   :  { %s107_s24 = sshrl.u32 %s804_s3, 3  ;;  %s108_s25 = sand.u32 7, %s804_s3  }
  0x84   :  { %s109_s0 = smul.u32 56, %s107_s24  ;;  %s92_s28 = sadd.s32 %s91_s23, %s90_s20 }
  0x85   :  { %s115_s27 = sshll.u32 %s545_s29, 4  ;;  %s257_s22 = sshll.u32 %s92_s28, 4  ;;  %s116_s27 = int_to_ptr.vmem [resolvable:$true] %s115_s27 }
  0x86   :  { %s110_s12 = sadd.s32 %s109_s0, %s108_s25  ;;  %s94_s7 = scalar_lea.hbm %s780_s1, %s257_s22 }
  0x87   :  { %s264_s8 = sshll.u32 %s110_s12, 4  ;;  %s413_s9 = scalar_lea.hbm %s94_s7, 112 }
  0x88   :  { %p414_p8 = scmp.ne.s32.totalorder %s94_s7, %s413_s9  ;;  %p416_p9 = scmp.lt.u32.totalorder %s94_s7, %s780_s1 }
  0x89   :  { %p417_p10 = scmp.lt.u32.totalorder %s597_s13, %s413_s9  ;;  %p419_p12 = scmp.lt.u32.totalorder %s413_s9, %s94_s7 }
  0x8b   :  { %p418_p11 = por %p417_p10, %p416_p9 }
  0x8d   :  { %p420_p13 = por %p419_p12, %p418_p11 }
  0x8f   :  { %p421_p0 = pnand %p420_p13, %p414_p8 }
  0x91   :  { %424 = shalt.err (!%p421_p0)  }
  0x92   :  { %s425_s30 = scalar_lea.vmem %s671_s5, 112  ;;  %p430_p2 = scmp.lt.s32.totalorder %s671_s5, %s575_s21 }
  0x93   :  { %p426_p1 = scmp.ne.s32.totalorder %s671_s5, %s425_s30  ;;  %p431_p4 = scmp.lt.s32.totalorder %s606_s17, %s425_s30 }
  0x95   :  { %p432_p7 = por %p431_p4, %p430_p2 }
  0x97   :  { %p433_p5 = pnand %p432_p7, %p426_p1 }
  0x99   :  { %436 = shalt.err (!%p433_p5)  }
  0x9a   :  { %100 = dma.hbm_to_vmem [thread:$0]  %s94_s7, 112, %s671_s5, [#allocation2], %s541_s18, %s541_s18, %s542_s19 }
  0x9b   :  { %s112_s15 = scalar_lea.hbm %s780_s1, %s264_s8 }
  0x9c   :  { %s437_s26 = scalar_lea.hbm %s112_s15, 112  ;;  %p440_p3 = scmp.lt.u32.totalorder %s112_s15, %s780_s1 }
  0x9d   :  { %p438_p6 = scmp.ne.s32.totalorder %s112_s15, %s437_s26  ;;  %p441_p8 = scmp.lt.u32.totalorder %s597_s13, %s437_s26 }
  0x9e   :  { %p443_p10 = scmp.lt.u32.totalorder %s437_s26, %s112_s15 }
  0x9f   :  { %p442_p9 = por %p441_p8, %p440_p3 }
  0xa1   :  { %p444_p11 = por %p443_p10, %p442_p9 }
  0xa3   :  { %p445_p12 = pnand %p444_p11, %p438_p6 }
  0xa5   :  { %448 = shalt.err (!%p445_p12)  }
  0xa6   :  { %s449_s23 = scalar_lea.vmem %s116_s27, 112  ;;  %p454_p0 = scmp.lt.s32.totalorder %s116_s27, %s575_s21 }
  0xa7   :  { %p450_p13 = scmp.ne.s32.totalorder %s116_s27, %s449_s23  ;;  %p455_p1 = scmp.lt.s32.totalorder %s606_s17, %s449_s23 }
  0xa9   :  { %p456_p2 = por %p455_p1, %p454_p0 }
  0xab   :  { %p457_p4 = pnand %p456_p2, %p450_p13 }
  0xad   :  { %460 = shalt.err (!%p457_p4)  }
  0xae   :  { %118 = dma.hbm_to_vmem [thread:$0]  %s112_s15, 112, %s116_s27, [#allocation2], %s541_s18, %s541_s18, %s542_s19 }
  0xaf   :  { %s265_s5 = sld [smem:[#allocation4 + $0x6]]  ;;  %s272_s24 = sld [smem:[#allocation4 + $0x7]] }
  0xb0   :  { %s546_s25 = smov [#allocation5 + $0x6]   ;;  %s547_s28 = smov [#allocation5 + $0x7]  }
  0xb1   :  { %s133_s0 = sshll.u32 %s546_s25, 4  ;;  %s151_s29 = sshll.u32 %s547_s28, 4  ;;  %s723_s0 = int_to_ptr.vmem [resolvable:$true] %s133_s0  ;;  %s725_s29 = int_to_ptr.vmem [resolvable:$true] %s151_s29 }
  0xb5   :  { %p121_p7 = scmp.gt.s32.totalorder %s265_s5, 0  ;;  %p266_p5 = scmp.lt.s32.totalorder %s265_s5, 4999 }
  0xb6   :  { %p139_p6 = scmp.gt.s32.totalorder %s272_s24, 0  ;;  %p273_p3 = scmp.lt.s32.totalorder %s272_s24, 4999 }
  0xb7   :  { %s806_s5 = smov (!%p121_p7, %s265_s5), 0 }
  0xb8   :  { %s808_s24 = smov (!%p139_p6, %s272_s24), 0  ;;  %s810_s5 = smov (!%p266_p5, %s806_s5), 4999 }
  0xb9   :  { %s812_s24 = smov (!%p273_p3, %s808_s24), 4999  ;;  %s125_s22 = sshrl.u32 %s810_s5, 3 }
  0xba   :  { %s126_s12 = sand.u32 7, %s810_s5   ;;  %s127_s27 = smul.u32 56, %s125_s22 }
  0xbb   :  { %s143_s4 = sshrl.u32 %s812_s24, 3  ;;  %s144_s6 = sand.u32 7, %s812_s24  }
  0xbc   :  { %s145_s7 = smul.u32 56, %s143_s4  ;;  %s128_s8 = sadd.s32 %s127_s27, %s126_s12 }
  0xbd   :  { %s271_s9 = sshll.u32 %s128_s8, 4 }
  0xbe   :  { %s146_s10 = sadd.s32 %s145_s7, %s144_s6  ;;  %s130_s3 = scalar_lea.hbm %s780_s1, %s271_s9 }
  0xbf   :  { %s278_s14 = sshll.u32 %s146_s10, 4  ;;  %s461_s15 = scalar_lea.hbm %s130_s3, 112 }
  0xc0   :  { %p462_p8 = scmp.ne.s32.totalorder %s130_s3, %s461_s15  ;;  %p464_p9 = scmp.lt.u32.totalorder %s130_s3, %s780_s1 }
  0xc1   :  { %p465_p10 = scmp.lt.u32.totalorder %s597_s13, %s461_s15  ;;  %p467_p12 = scmp.lt.u32.totalorder %s461_s15, %s130_s3 }
  0xc3   :  { %p466_p11 = por %p465_p10, %p464_p9 }
  0xc5   :  { %p468_p13 = por %p467_p12, %p466_p11 }
  0xc7   :  { %p469_p0 = pnand %p468_p13, %p462_p8 }
  0xc9   :  { %472 = shalt.err (!%p469_p0)  }
  0xca   :  { %s473_s20 = scalar_lea.vmem %s723_s0, 112  ;;  %p478_p2 = scmp.lt.s32.totalorder %s723_s0, %s575_s21 }
  0xcb   :  { %p474_p1 = scmp.ne.s32.totalorder %s723_s0, %s473_s20  ;;  %p479_p4 = scmp.lt.s32.totalorder %s606_s17, %s473_s20 }
  0xcd   :  { %p480_p7 = por %p479_p4, %p478_p2 }
  0xcf   :  { %p481_p5 = pnand %p480_p7, %p474_p1 }
  0xd1   :  { %484 = shalt.err (!%p481_p5)  }
  0xd2   :  { %136 = dma.hbm_to_vmem [thread:$0]  %s130_s3, 112, %s723_s0, [#allocation2], %s541_s18, %s541_s18, %s542_s19 }
  0xd3   :  { %s148_s24 = scalar_lea.hbm %s780_s1, %s278_s14 }
  0xd4   :  { %s485_s25 = scalar_lea.hbm %s148_s24, 112  ;;  %p488_p3 = scmp.lt.u32.totalorder %s148_s24, %s780_s1 }
  0xd5   :  { %p486_p6 = scmp.ne.s32.totalorder %s148_s24, %s485_s25  ;;  %p489_p8 = scmp.lt.u32.totalorder %s597_s13, %s485_s25 }
  0xd6   :  { %p491_p10 = scmp.lt.u32.totalorder %s485_s25, %s148_s24 }
  0xd7   :  { %p490_p9 = por %p489_p8, %p488_p3 }
  0xd9   :  { %p492_p11 = por %p491_p10, %p490_p9 }
  0xdb   :  { %p493_p12 = pnand %p492_p11, %p486_p6 }
  0xdd   :  { %496 = shalt.err (!%p493_p12)  }
  0xde   :  { %s497_s0 = scalar_lea.vmem %s725_s29, 112  ;;  %p502_p0 = scmp.lt.s32.totalorder %s725_s29, %s575_s21 }
  0xdf   :  { %p498_p13 = scmp.ne.s32.totalorder %s725_s29, %s497_s0  ;;  %p503_p1 = scmp.lt.s32.totalorder %s606_s17, %s497_s0 }
  0xe1   :  { %p504_p2 = por %p503_p1, %p502_p0 }
  0xe3   :  { %p505_p4 = pnand %p504_p2, %p498_p13 }
  0xe5   :  { %508 = shalt.err (!%p505_p4)  }
  0xe6   :  { %154 = dma.hbm_to_vmem [thread:$0]  %s148_s24, 112, %s725_s29, [#allocation2], %s541_s18, %s541_s18, %s542_s19 }
  0xe7   :  { %533 = dma.done.wait [#allocation2], 896 }
  0xe8   :  { %534 = vsyncadd [#allocation2], 4294966400  ;;  %p510_p7 = scmp.ne.s32.totalorder %s575_s21, %s606_s17  ;;  %p515_p5 = scmp.lt.s32.totalorder %s606_s17, %s606_s17 }
  0xe9   :  { %p784_p6 = scmp.lt.s32.totalorder %s575_s21, %s575_s21 }
  0xeb   :  { %p516_p3 = por %p515_p5, %p784_p6 }
  0xed   :  { %p517_p8 = pnand %p516_p3, %p510_p7 }
  0xef   :  { %520 = shalt.err (!%p517_p8)
}
  0xf0   :  { %s521_s12 = scalar_lea.hbm %s781_s2, 896 }
  0xf1   :  { %p522_p9 = scmp.ne.s32.totalorder %s781_s2, %s521_s12  ;;  %p525_p10 = scmp.lt.u32.totalorder %s521_s12, %s781_s2 }
  0xf3   :  { %p527_p11 = pnand %p525_p10, %p522_p9 }
  0xf5   :  { %530 = shalt.err (!%p527_p11)
}
  0xf6   :  { %181 = dma.vmem_to_hbm [thread:$0]  %s575_s21, 896, %s781_s2, [#allocation6]  }
  0xf7   :  { %535 = dma.done.wait [#allocation6], 896  }
  0xf8   :  { %536 = vsyncadd [#allocation6], 4294966400 }
  0xf9   :  { %185 = vsyncpa [#allocation6], 1 }
  0xfa   :  { %186 = vsyncmov [#allocation2] }
  0xfd   :  { %s187_s6 = vpop.sfrf %186 }
  0xfe   :  { %p279_p12 = scmp.ne.s32.totalorder %s187_s6, 0 }
 0x100   :  { %191 = shalt.err (%p279_p12)  }

</bundles_post_ra>
